<compile_context>
chip_gen: v7x
topology: tpu7x:2x2x1
jax: 0.10.0
libtpu: 0.0.40
codegen_flags: <defaults>
</compile_context>

<pallas_src>
import jax
import jax.numpy as jnp
from jax.experimental import pallas as pl
from jax.experimental.pallas import tpu as pltpu


# ------------------------------ fused kernel --------------------------------

def _dnn_kernel(x_ref, w1_ref, b1_ref, w2_ref, b2_ref, w3_ref, b3_ref, o_ref):
    # x:  (tm, F)     bf16
    # w1: (F, 512)    bf16   b1: (1, 512) f32
    # w2: (512, 256)  bf16   b2: (1, 256) f32
    # w3: (1, 256)    bf16   b3: (1, 1)   f32
    # o:  (tm, 1)     f32
    x = x_ref[...]

    # Layer 1: bf16 MXU matmul, f32 accumulate; bias/ReLU in f32 on the VPU.
    h1 = jnp.dot(x, w1_ref[...], preferred_element_type=jnp.float32)
    h1 = jnp.maximum(h1 + b1_ref[...], 0.0)
    # dropout_layer1 (p=0.3): identity at inference

    # Layer 2: re-cast activations to bf16 for the MXU, keep f32 accumulation.
    h2 = jnp.dot(h1.astype(jnp.bfloat16), w2_ref[...],
                 preferred_element_type=jnp.float32)
    h2 = jnp.maximum(h2 + b2_ref[...], 0.0)
    # dropout_layer2 (p=0.3): identity at inference

    # Layer 3 (N=1): VPU broadcast-multiply + lane reduction instead of a
    # nearly-empty MXU pass (layer 3 is 0.13% of FLOPs but ~20% of MXU passes).
    w3_row = w3_ref[...].astype(jnp.float32)                          # (1, 256)
    out = jnp.sum(h2 * w3_row, axis=-1, keepdims=True) + b3_ref[...]  # (tm, 1)
    # TODO(synk): a lane-dense (1, tm) output layout would avoid the masked
    # vst.msk column store; output bytes are negligible so the verified column
    # store path is kept.
    o_ref[...] = out.astype(o_ref.dtype)


def dnn_forward(x, params):
    """x: (B, time_steps, features) -> (B, 1). Entire forward in one pallas_call."""
    B = x.shape[0]
    F = params["w1"].shape[0]                        # flattened feature dim
    H1 = params["w1"].shape[1]                       # 512 (padded 500)
    H2 = params["w2"].shape[1]                       # 256 (padded 250)
    O = 1

    # nn.Flatten (pure layout) + bf16 matmul operand (accumulation stays f32).
    x2 = x.reshape(B, F).astype(jnp.bfloat16)

    # Row tiling: one block for small/medium batches, 512-row tiles for large
    # batches.  Weights stay VMEM-resident across the grid (constant index maps).
    tile_m = B if B <= 512 else 512
    num_tiles = pl.cdiv(B, tile_m)
    grid = (num_tiles,)

    def const_spec(shape):
        # Constant index map -> the pipeliner hoists the DMA out of the grid loop,
        # so weights/biases are fetched once and stay resident in VMEM.
        return pl.BlockSpec(shape, lambda i: (0, 0))

    out = pl.pallas_call(
        _dnn_kernel,
        out_shape=jax.ShapeDtypeStruct((B, O), jnp.float32),
        grid=grid,
        in_specs=[
            pl.BlockSpec((tile_m, F), lambda i: (i, 0)),
            const_spec((F, H1)), const_spec((1, H1)),
            const_spec((H1, H2)), const_spec((1, H2)),
            const_spec((1, H2)), const_spec((1, 1)),
        ],
        out_specs=pl.BlockSpec((tile_m, O), lambda i: (i, 0)),
        compiler_params=pltpu.CompilerParams(
            dimension_semantics=("parallel",)),
    )(x2, params["w1"], params["b1"], params["w2"], params["b2"],
      params["w3"], params["b3"])
    return out


# --------------------------- parameter construction --------------------------

def init_params(key, time_steps, features):
    """PyTorch-default-init params, pre-transposed to (in, out), zero-padded to
    lane-aligned hidden widths (500->512, 250->256), weights stored bf16."""
    flattened = time_steps * features
    H1, H2 = 500, 250
    H1P, H2P = 512, 256

    def linear(k, fan_in, fan_out):
        kw, kb = jax.random.split(k)
        bound = 1.0 / (fan_in ** 0.5)                 # PyTorch nn.Linear default init
        w = jax.random.uniform(kw, (fan_in, fan_out), jnp.float32, -bound, bound)
        b = jax.random.uniform(kb, (1, fan_out), jnp.float32, -bound, bound)
        return w, b

    k1, k2, k3 = jax.random.split(key, 3)
    w1, b1 = linear(k1, flattened, H1)                # (F, 500), (1, 500)
    w2, b2 = linear(k2, H1, H2)                       # (500, 250), (1, 250)
    w3, b3 = linear(k3, H2, 1)                        # (250, 1),  (1, 1)

    # Zero padding keeps the math identical: padded h1 lanes are ReLU(0)=0, padded
    # w2 rows/cols are 0, padded h2 lanes are 0, padded w3 rows are 0.
    w1 = jnp.pad(w1, ((0, 0), (0, H1P - H1)))
    b1 = jnp.pad(b1, ((0, 0), (0, H1P - H1)))
    w2 = jnp.pad(w2, ((0, H1P - H1), (0, H2P - H2)))
    b2 = jnp.pad(b2, ((0, 0), (0, H2P - H2)))
    w3_row = jnp.pad(w3, ((0, H2P - H2), (0, 0))).T   # (1, 256) row for VPU layer 3

    return {
        "w1": w1.astype(jnp.bfloat16),
        "b1": b1,                                      # biases kept f32 (added post-accum)
        "w2": w2.astype(jnp.bfloat16),
        "b2": b2,
        "w3": w3_row.astype(jnp.bfloat16),
        "b3": b3,
    }


# ----------------------------------- main ------------------------------------

if __name__ == "__main__":
    TIME_STEPS = 8
    FEATURES = 16          # flattened_data = 128 -> lane-dense MXU contraction dim
    BATCH = 4

    key = jax.random.PRNGKey(0)
    kx, kp = jax.random.split(key)

    x = jax.random.normal(kx, (BATCH, TIME_STEPS, FEATURES), jnp.float32)
    params = init_params(kp, TIME_STEPS, FEATURES)

    fwd = jax.jit(dnn_forward)
    out = fwd(x, params)
    jax.block_until_ready(out)

    # Pure-JAX reference with the same bf16 operands / f32 accumulation.
    xf = x.reshape(BATCH, -1).astype(jnp.bfloat16)
    r1 = jnp.maximum(jnp.dot(xf, params["w1"], preferred_element_type=jnp.float32)
                     + params["b1"], 0.0)
    r2 = jnp.maximum(jnp.dot(r1.astype(jnp.bfloat16), params["w2"],
                             preferred_element_type=jnp.float32) + params["b2"], 0.0)
    ref = jnp.sum(r2 * params["w3"].astype(jnp.float32), axis=-1,
                  keepdims=True) + params["b3"]

    assert out.shape == (BATCH, 1), out.shape
    assert bool(jnp.all(jnp.isfinite(out)))
    assert bool(jnp.allclose(out, ref, rtol=5e-2, atol=5e-2)), (out, ref)
    print("KERNEL_OK")
</pallas_src>

<mosaic_0001>
module attributes {stable_mosaic.version = 11 : i64} {
  func.func @_dnn_kernel(%arg0: i32, %arg1: memref<4x128xbf16, #tpu.memory_space<vmem>>, %arg2: memref<128x512xbf16, #tpu.memory_space<vmem>>, %arg3: memref<1x512xf32, #tpu.memory_space<vmem>>, %arg4: memref<512x256xbf16, #tpu.memory_space<vmem>>, %arg5: memref<1x256xf32, #tpu.memory_space<vmem>>, %arg6: memref<1x256xbf16, #tpu.memory_space<vmem>>, %arg7: memref<1x1xf32, #tpu.memory_space<vmem>>, %arg8: memref<4x1xf32, #tpu.memory_space<vmem>>) attributes {dimension_semantics = [#tpu.dimension_semantics<parallel>], iteration_bounds = array<i64: 1>, scalar_prefetch = 0 : i64, scratch_operands = 0 : i64, tpu.core_type = #tpu.core_type<tc>, window_params = [{transform_indices = @transform_0, window_bounds = array<i64: 4, 128>}, {pipeline_mode = #tpu.pipeline_mode<synchronous>, transform_indices = @transform_1, window_bounds = array<i64: 128, 512>}, {pipeline_mode = #tpu.pipeline_mode<synchronous>, transform_indices = @transform_2, window_bounds = array<i64: 1, 512>}, {pipeline_mode = #tpu.pipeline_mode<synchronous>, transform_indices = @transform_3, window_bounds = array<i64: 512, 256>}, {pipeline_mode = #tpu.pipeline_mode<synchronous>, transform_indices = @transform_4, window_bounds = array<i64: 1, 256>}, {pipeline_mode = #tpu.pipeline_mode<synchronous>, transform_indices = @transform_5, window_bounds = array<i64: 1, 256>}, {pipeline_mode = #tpu.pipeline_mode<synchronous>, transform_indices = @transform_6, window_bounds = array<i64: 1, 1>}, {transform_indices = @transform_7, window_bounds = array<i64: 4, 1>}]} {
    %c0 = arith.constant 0 : index
    %c0_0 = arith.constant 0 : index
    %0 = vector.load %arg1[%c0, %c0_0] : memref<4x128xbf16, #tpu.memory_space<vmem>>, vector<4x128xbf16>
    %c0_1 = arith.constant 0 : index
    %c0_2 = arith.constant 0 : index
    %1 = vector.load %arg2[%c0_1, %c0_2] : memref<128x512xbf16, #tpu.memory_space<vmem>>, vector<128x512xbf16>
    %cst = arith.constant dense<0.000000e+00> : vector<4x512xf32>
    %2 = tpu.matmul %0, %1, %cst {dimension_numbers = #tpu.dot_dimension_numbers<[1], [0], [0], [1], [0, 0, 1, 1], [], []>} : vector<4x128xbf16>, vector<128x512xbf16>, vector<4x512xf32> -> vector<4x512xf32>
    %c0_3 = arith.constant 0 : index
    %c0_4 = arith.constant 0 : index
    %3 = vector.load %arg3[%c0_3, %c0_4] : memref<1x512xf32, #tpu.memory_space<vmem>>, vector<1x512xf32>
    %4 = vector.broadcast %3 : vector<1x512xf32> to vector<4x512xf32>
    %5 = arith.addf %2, %4 : vector<4x512xf32>
    %cst_5 = arith.constant 0.000000e+00 : f32
    %6 = vector.broadcast %cst_5 : f32 to vector<4x512xf32>
    %7 = arith.maximumf %5, %6 : vector<4x512xf32>
    %8 = arith.truncf %7 : vector<4x512xf32> to vector<4x512xbf16>
    %c0_6 = arith.constant 0 : index
    %c0_7 = arith.constant 0 : index
    %9 = vector.load %arg4[%c0_6, %c0_7] : memref<512x256xbf16, #tpu.memory_space<vmem>>, vector<512x256xbf16>
    %cst_8 = arith.constant dense<0.000000e+00> : vector<4x256xf32>
    %10 = tpu.matmul %8, %9, %cst_8 {dimension_numbers = #tpu.dot_dimension_numbers<[1], [0], [0], [1], [0, 0, 1, 1], [], []>} : vector<4x512xbf16>, vector<512x256xbf16>, vector<4x256xf32> -> vector<4x256xf32>
    %c0_9 = arith.constant 0 : index
    %c0_10 = arith.constant 0 : index
    %11 = vector.load %arg5[%c0_9, %c0_10] : memref<1x256xf32, #tpu.memory_space<vmem>>, vector<1x256xf32>
    %12 = vector.broadcast %11 : vector<1x256xf32> to vector<4x256xf32>
    %13 = arith.addf %10, %12 : vector<4x256xf32>
    %cst_11 = arith.constant 0.000000e+00 : f32
    %14 = vector.broadcast %cst_11 : f32 to vector<4x256xf32>
    %15 = arith.maximumf %13, %14 : vector<4x256xf32>
    %c0_12 = arith.constant 0 : index
    %c0_13 = arith.constant 0 : index
    %16 = vector.load %arg6[%c0_12, %c0_13] : memref<1x256xbf16, #tpu.memory_space<vmem>>, vector<1x256xbf16>
    %17 = arith.extf %16 : vector<1x256xbf16> to vector<1x256xf32>
    %18 = vector.broadcast %17 : vector<1x256xf32> to vector<4x256xf32>
    %19 = arith.mulf %15, %18 : vector<4x256xf32>
    %cst_14 = arith.constant dense<0.000000e+00> : vector<4xf32>
    %20 = vector.multi_reduction <add>, %19, %cst_14 [1] : vector<4x256xf32> to vector<4xf32>
    %21 = vector.shape_cast %20 : vector<4xf32> to vector<4x1xf32>
    %c0_15 = arith.constant 0 : index
    %c0_16 = arith.constant 0 : index
    %22 = vector.load %arg7[%c0_15, %c0_16] : memref<1x1xf32, #tpu.memory_space<vmem>>, vector<1x1xf32>
    %23 = vector.broadcast %22 : vector<1x1xf32> to vector<4x1xf32>
    %24 = arith.addf %21, %23 : vector<4x1xf32>
    %c0_17 = arith.constant 0 : index
    %c0_18 = arith.constant 0 : index
    %25 = vector.load %arg8[%c0_17, %c0_18] : memref<4x1xf32, #tpu.memory_space<vmem>>, vector<4x1xf32>
    tpu.vector_store %arg8[%c0_17, %c0_18], %24 {strides = array<i32>} : memref<4x1xf32, #tpu.memory_space<vmem>>, vector<4x1xf32>,
    return
  }
  func.func @transform_0(%arg0: i32) -> (i32, i32) {
    %c0_i32 = arith.constant 0 : i32
    %c0_i32_0 = arith.constant 0 : i32
    return %arg0, %c0_i32 : i32, i32
  }
  func.func @transform_1(%arg0: i32) -> (i32, i32) {
    %c0_i32 = arith.constant 0 : i32
    %c0_i32_0 = arith.constant 0 : i32
    %c0_i32_1 = arith.constant 0 : i32
    return %c0_i32, %c0_i32_0 : i32, i32
  }
  func.func @transform_2(%arg0: i32) -> (i32, i32) {
    %c0_i32 = arith.constant 0 : i32
    %c0_i32_0 = arith.constant 0 : i32
    %c0_i32_1 = arith.constant 0 : i32
    return %c0_i32, %c0_i32_0 : i32, i32
  }
  func.func @transform_3(%arg0: i32) -> (i32, i32) {
    %c0_i32 = arith.constant 0 : i32
    %c0_i32_0 = arith.constant 0 : i32
    %c0_i32_1 = arith.constant 0 : i32
    return %c0_i32, %c0_i32_0 : i32, i32
  }
  func.func @transform_4(%arg0: i32) -> (i32, i32) {
    %c0_i32 = arith.constant 0 : i32
    %c0_i32_0 = arith.constant 0 : i32
    %c0_i32_1 = arith.constant 0 : i32
    return %c0_i32, %c0_i32_0 : i32, i32
  }
  func.func @transform_5(%arg0: i32) -> (i32, i32) {
    %c0_i32 = arith.constant 0 : i32
    %c0_i32_0 = arith.constant 0 : i32
    %c0_i32_1 = arith.constant 0 : i32
    return %c0_i32, %c0_i32_0 : i32, i32
  }
  func.func @transform_6(%arg0: i32) -> (i32, i32) {
    %c0_i32 = arith.constant 0 : i32
    %c0_i32_0 = arith.constant 0 : i32
    %c0_i32_1 = arith.constant 0 : i32
    return %c0_i32, %c0_i32_0 : i32, i32
  }
  func.func @transform_7(%arg0: i32) -> (i32, i32) {
    %c0_i32 = arith.constant 0 : i32
    %c0_i32_0 = arith.constant 0 : i32
    return %arg0, %c0_i32 : i32, i32
  }
}

</mosaic_0001>

<bundles_post_ra>
// kernel: dnn_forward.1
= control target key start
LH: loop header
LB: loop body
LE: loop exit
PB: predicated region body
PF: predicated region fallthrough
CT: control target
= control target key end

     0   :  { %s1276_s0 = inlined_call_operand.vmem [shape: bf16[4,128], index: 0, kind: input, shape index: {}]   ;;  %s1277_s1 = inlined_call_operand.hbm [shape: bf16[128,512], index: 1, kind: input, shape index: {}]   ;;  %s1278_s2 = inlined_call_operand.vmem [shape: f32[1,512], index: 2, kind: input, shape index: {}]   ;;  %s1279_s3 = inlined_call_operand.hbm [shape: bf16[512,256], index: 3, kind: input, shape index: {}]   ;;  %s1280_s4 = inlined_call_operand.vmem [shape: f32[1,256], index: 4, kind: input, shape index: {}]   ;;  %s1281_s5 = inlined_call_operand.vmem [shape: bf16[1,256], index: 5, kind: input, shape index: {}]   ;;  %s1282_s6 = inlined_call_operand.<no memory space> [shape: f32[1,1], index: 6, kind: input, shape index: {}]   ;;  %s1283_s7 = inlined_call_operand.vmem [shape: f32[4,1], index: 7, kind: output, shape index: {}]  }
   0x1   :  { %v12_v0 = vstv %s1282_s6 }
   0x2   :  { %13 = vst [vmem:[#allocation2] sm:$0x1] %v12_v0 }
   0x3   :  { %14 = vsyncpa [#allocation4], 0 }
   0x4   :  { %15 = vsyncpa [#allocation6], 0  ;;  %s1187_s26 = smov [#allocation3]   ;;  %s1139_s30 = scalar_lea.hbm %s1277_s1, 4096 }
   0x5   :  { %s23_s27 = sshll.u32 %s1187_s26, 4  ;;  %p1140_p0 = scmp.ne.s32.totalorder %s1277_s1, %s1139_s30  ;;  %s24_s27 = int_to_ptr.vmem [resolvable:$true] %s23_s27 }
   0x6   :  { %p1143_p1 = scmp.lt.u32.totalorder %s1139_s30, %s1277_s1 }
   0x8   :  { %p1145_p2 = pnand %p1143_p1, %p1140_p0 }
   0xa   :  { %1148 = shalt.err (!%p1145_p2)
}
   0xb   :  { %s1149_s6 = scalar_lea.vmem %s24_s27, 4096  ;;  %p1154_p4 = scmp.lt.s32.totalorder %s24_s27, %s24_s27 }
   0xc   :  { %p1150_p3 = scmp.ne.s32.totalorder %s24_s27, %s1149_s6  ;;  %p1155_p5 = scmp.lt.s32.totalorder %s1149_s6, %s1149_s6 }
   0xe   :  { %p1156_p6 = por %p1155_p5, %p1154_p4 }
  0x10   :  { %p1157_p7 = pnand %p1156_p6, %p1150_p3 }
  0x12   :  { %1160 = shalt.err (!%p1157_p7)
}
  0x13   :  { %s1188_s12 = smov 256   ;;  %s1189_s13 = smov 16  }
  0x14   :  { %29 = dma.hbm_to_vmem [thread:$0]  %s1277_s1, 4096, %s24_s27, [#allocation4], %s1188_s12, %s1188_s12, %s1189_s13  }
  0x15   :  { %s1190_s16 = smov [#allocation5]   ;;  %s1161_s20 = scalar_lea.hbm %s1279_s3, 8192 }
  0x16   :  { %s37_s17 = sshll.u32 %s1190_s16, 4  ;;  %p1162_p8 = scmp.ne.s32.totalorder %s1279_s3, %s1161_s20  ;;  %s38_s17 = int_to_ptr.vmem [resolvable:$true] %s37_s17 }
  0x17   :  { %p1165_p9 = scmp.lt.u32.totalorder %s1161_s20, %s1279_s3 }
  0x19   :  { %p1167_p10 = pnand %p1165_p9, %p1162_p8 }
  0x1b   :  { %1170 = shalt.err (!%p1167_p10)
}
  0x1c   :  { %s1171_s25 = scalar_lea.vmem %s38_s17, 8192  ;;  %p1176_p12 = scmp.lt.s32.totalorder %s38_s17, %s38_s17 }
  0x1d   :  { %p1172_p11 = scmp.ne.s32.totalorder %s38_s17, %s1171_s25  ;;  %p1177_p13 = scmp.lt.s32.totalorder %s1171_s25, %s1171_s25 }
  0x1f   :  { %p1178_p0 = por %p1177_p13, %p1176_p12 }
  0x21   :  { %p1179_p1 = pnand %p1178_p0, %p1172_p11 }
  0x23   :  { %1182 = shalt.err (!%p1179_p1)
}
  0x24   :  { %s1191_s1 = smov 128   ;;  %s1192_s26 = smov 8  }
  0x25   :  { %43 = dma.hbm_to_vmem [thread:$0]  %s1279_s3, 8192, %s38_s17, [#allocation6], %s1191_s1, %s1191_s1, %s1192_s26  }
  0x26   :  { %1183 = dma.done.wait [#allocation4], 4096  }
  0x27   :  { %1184 = vsyncadd [#allocation4], 4294963200 }
  0x28   :  { %1185 = dma.done.wait [#allocation6], 8192  }
  0x29   :  { %1186 = vsyncadd [#allocation6], 4294959104  ;;  %v1193_v1 = vmov 0   ;;  %v995_v2 = vld [vmem:[#allocation3 + $0x4] ss:$16 sps:$4 sm:$0xff]   ;;  %vm865_vm0 = vcmask 1043456  }
  0x2a   :  { %304 = vmatprep.mubr.bf16.mxu0 %v1193_v1  ;;  %345 = vmatprep.mubr.bf16.mxu1 %v1193_v1  ;;  %v997_v3 = vld [vmem:[#allocation3 + $0xc] ss:$16 sps:$4 sm:$0xff]   ;;  %v999_v4 = vld [vmem:[#allocation3] ss:$16 sps:$4 sm:$0xff]   ;;  %v1000_v5 = vld [vmem:[#allocation3 + $0x8] ss:$16 sps:$4 sm:$0xff]  }
  0x2b   :  { %272 = vmatprep.subr.bf16.mxu0 %v995_v2  ;;  %313 = vmatprep.subr.bf16.mxu1 %v997_v3  ;;  %v1001_v6 = vld [vmem:[#allocation3 + $0x24] ss:$16 sps:$4 sm:$0xff]   ;;  %v1003_v7 = vld [vmem:[#allocation3 + $0x2c] ss:$16 sps:$4 sm:$0xff]   ;;  %v1005_v8 = vld [vmem:[#allocation3 + $0x20] ss:$16 sps:$4 sm:$0xff]  }
  0x2c   :  { %273 = vmatpush1.bf16.msra.mxu0 %v999_v4  ;;  %314 = vmatpush1.bf16.msra.mxu1 %v1000_v5  ;;  %v1006_v9 = vld [vmem:[#allocation3 + $0x28] ss:$16 sps:$4 sm:$0xff]   ;;  %v1007_v10 = vld [vmem:[#allocation3 + $0x44] ss:$16 sps:$4 sm:$0xff]   ;;  %v1009_v11 = vld [vmem:[#allocation3 + $0x4c] ss:$16 sps:$4 sm:$0xff]  }
  0x2d   :  { %274 = vmatprep.subr.bf16.mxu0 %v1001_v6  ;;  %315 = vmatprep.subr.bf16.mxu1 %v1003_v7  ;;  %v1011_v12 = vld [vmem:[#allocation3 + $0x40] ss:$16 sps:$4 sm:$0xff]   ;;  %v1012_v13 = vld [vmem:[#allocation3 + $0x48] ss:$16 sps:$4 sm:$0xff]   ;;  %v1013_v14 = vld [vmem:[#allocation3 + $0x64] ss:$16 sps:$4 sm:$0xff]  }
  0x2e   :  { %v1015_v15 = vld [vmem:[#allocation3 + $0x6c] ss:$16 sps:$4 sm:$0xff]   ;;  %v1017_v16 = vld [vmem:[#allocation3 + $0x60] ss:$16 sps:$4 sm:$0xff]   ;;  %v1018_v17 = vld [vmem:[#allocation3 + $0x68] ss:$16 sps:$4 sm:$0xff]  }
  0x2f   :  { %v1019_v18 = vld [vmem:[#allocation3 + $0x84] ss:$16 sps:$4 sm:$0xff]   ;;  %v1021_v19 = vld [vmem:[#allocation3 + $0x8c] ss:$16 sps:$4 sm:$0xff]   ;;  %v1023_v20 = vld [vmem:[#allocation3 + $0x80] ss:$16 sps:$4 sm:$0xff]  }
  0x30   :  { %275 = vmatpush1.bf16.msra.mxu0 %v1005_v8  ;;  %316 = vmatpush1.bf16.msra.mxu1 %v1006_v9  ;;  %v1024_v21 = vld [vmem:[#allocation3 + $0x88] ss:$16 sps:$4 sm:$0xff]   ;;  %v1025_v22 = vld [vmem:[#allocation3 + $0xa4] ss:$16 sps:$4 sm:$0xff]   ;;  %v1027_v23 = vld [vmem:[#allocation3 + $0xac] ss:$16 sps:$4 sm:$0xff]  }
  0x31   :  { %276 = vmatprep.subr.bf16.mxu0 %v1007_v10  ;;  %317 = vmatprep.subr.bf16.mxu1 %v1009_v11  ;;  %v1029_v24 = vld [vmem:[#allocation3 + $0xa0] ss:$16 sps:$4 sm:$0xff]   ;;  %v1030_v25 = vld [vmem:[#allocation3 + $0xa8] ss:$16 sps:$4 sm:$0xff]   ;;  %v1031_v26 = vld [vmem:[#allocation3 + $0xc4] ss:$16 sps:$4 sm:$0xff]  }
  0x32   :  { %v1033_v27 = vld [vmem:[#allocation3 + $0xcc] ss:$16 sps:$4 sm:$0xff]   ;;  %v1035_v28 = vld [vmem:[#allocation3 + $0xc0] ss:$16 sps:$4 sm:$0xff]   ;;  %v1036_v29 = vld [vmem:[#allocation3 + $0xc8] ss:$16 sps:$4 sm:$0xff]  }
  0x33   :  { %v1037_v30 = vld [vmem:[#allocation3 + $0xe4] ss:$16 sps:$4 sm:$0xff]   ;;  %v1039_v31 = vld [vmem:[#allocation3 + $0xec] ss:$16 sps:$4 sm:$0xff]   ;;  %v1041_v32 = vld [vmem:[#allocation3 + $0xe0] ss:$16 sps:$4 sm:$0xff]  }
  0x34   :  { %277 = vmatpush1.bf16.msra.mxu0 %v1011_v12  ;;  %318 = vmatpush1.bf16.msra.mxu1 %v1012_v13  ;;  %v1042_v33 = vld [vmem:[#allocation3 + $0xe8] ss:$16 sps:$4 sm:$0xff]   ;;  %v1045_v34 = vld [vmem:[#allocation5 + $0x4] ss:$8 sps:$4 sm:$0xff]   ;;  %v57_v36 = vld [vmem:[%s1276_s0] sm:$0x3] }
  0x35   :  { %278 = vmatprep.subr.bf16.mxu0 %v1013_v14  ;;  %319 = vmatprep.subr.bf16.mxu1 %v1015_v15  ;;  %v1048_v35 = vld [vmem:[#allocation5 + $0x104] ss:$8 sps:$4 sm:$0xff]   ;;  %v1043_v37 = vld [vmem:[#allocation5] ss:$8 sps:$4 sm:$0xff]   ;;  %v1051_v39 = vld [vmem:[#allocation5 + $0x14] ss:$8 sps:$4 sm:$0xff]  }
  0x36   :  { %v1046_v38 = vld [vmem:[#allocation5 + $0x100] ss:$8 sps:$4 sm:$0xff]   ;;  %v1054_v40 = vld [vmem:[#allocation5 + $0x114] ss:$8 sps:$4 sm:$0xff]   ;;  %v1049_v41 = vld [vmem:[#allocation5 + $0x10] ss:$8 sps:$4 sm:$0xff]  }
  0x37   :  { %v1052_v42 = vld [vmem:[#allocation5 + $0x110] ss:$8 sps:$4 sm:$0xff]   ;;  %v1057_v43 = vld [vmem:[#allocation5 + $0x24] ss:$8 sps:$4 sm:$0xff]   ;;  %v1055_v45 = vld [vmem:[#allocation5 + $0x20] ss:$8 sps:$4 sm:$0xff]  }
  0x38   :  { %279 = vmatpush1.bf16.msra.mxu0 %v1017_v16  ;;  %320 = vmatpush1.bf16.msra.mxu1 %v1018_v17  ;;  %v1060_v44 = vld [vmem:[#allocation5 + $0x124] ss:$8 sps:$4 sm:$0xff]   ;;  %v1058_v46 = vld [vmem:[#allocation5 + $0x120] ss:$8 sps:$4 sm:$0xff]   ;;  %v1063_v47 = vld [vmem:[#allocation5 + $0x34] ss:$8 sps:$4 sm:$0xff]  }
  0x39   :  { %280 = vmatprep.subr.bf16.mxu0 %v1019_v18  ;;  %321 = vmatprep.subr.bf16.mxu1 %v1021_v19  ;;  %v1066_v48 = vld [vmem:[#allocation5 + $0x134] ss:$8 sps:$4 sm:$0xff]   ;;  %v1061_v49 = vld [vmem:[#allocation5 + $0x30] ss:$8 sps:$4 sm:$0xff]   ;;  %v1069_v51 = vld [vmem:[#allocation5 + $0x44] ss:$8 sps:$4 sm:$0xff]  }
  0x3a   :  { %v1064_v50 = vld [vmem:[#allocation5 + $0x130] ss:$8 sps:$4 sm:$0xff]   ;;  %v1072_v52 = vld [vmem:[#allocation5 + $0x144] ss:$8 sps:$4 sm:$0xff]   ;;  %v1067_v53 = vld [vmem:[#allocation5 + $0x40] ss:$8 sps:$4 sm:$0xff]  }
  0x3b   :  { %v1070_v54 = vld [vmem:[#allocation5 + $0x140] ss:$8 sps:$4 sm:$0xff]   ;;  %v1075_v55 = vld [vmem:[#allocation5 + $0x54] ss:$8 sps:$4 sm:$0xff]   ;;  %v1073_v57 = vld [vmem:[#allocation5 + $0x50] ss:$8 sps:$4 sm:$0xff]  }
  0x3c   :  { %281 = vmatpush1.bf16.msra.mxu0 %v1023_v20  ;;  %322 = vmatpush1.bf16.msra.mxu1 %v1024_v21  ;;  %v1078_v56 = vld [vmem:[#allocation5 + $0x154] ss:$8 sps:$4 sm:$0xff]   ;;  %v1076_v58 = vld [vmem:[#allocation5 + $0x150] ss:$8 sps:$4 sm:$0xff]   ;;  %v1081_v59 = vld [vmem:[#allocation5 + $0x64] ss:$8 sps:$4 sm:$0xff]  }
  0x3d   :  { %282 = vmatprep.subr.bf16.mxu0 %v1025_v22  ;;  %323 = vmatprep.subr.bf16.mxu1 %v1027_v23  ;;  %v1084_v60 = vld [vmem:[#allocation5 + $0x164] ss:$8 sps:$4 sm:$0xff]   ;;  %v1079_v61 = vld [vmem:[#allocation5 + $0x60] ss:$8 sps:$4 sm:$0xff]   ;;  %v1087_v63 = vld [vmem:[#allocation5 + $0x74] ss:$8 sps:$4 sm:$0xff]  }
  0x3e   :  { %v1082_v62 = vld [vmem:[#allocation5 + $0x160] ss:$8 sps:$4 sm:$0xff]   ;;  %v1090_v0 = vld [vmem:[#allocation5 + $0x174] ss:$8 sps:$4 sm:$0xff]   ;;  %v1085_v1 = vld [vmem:[#allocation5 + $0x70] ss:$8 sps:$4 sm:$0xff]  }
  0x3f   :  { %v1088_v2 = vld [vmem:[#allocation5 + $0x170] ss:$8 sps:$4 sm:$0xff]   ;;  %v1093_v3 = vld [vmem:[#allocation5 + $0x84] ss:$8 sps:$4 sm:$0xff]   ;;  %v1091_v5 = vld [vmem:[#allocation5 + $0x80] ss:$8 sps:$4 sm:$0xff]  }
  0x40   :  { %283 = vmatpush1.bf16.msra.mxu0 %v1029_v24  ;;  %324 = vmatpush1.bf16.msra.mxu1 %v1030_v25  ;;  %v1096_v4 = vld [vmem:[#allocation5 + $0x184] ss:$8 sps:$4 sm:$0xff]   ;;  %v1094_v6 = vld [vmem:[#allocation5 + $0x180] ss:$8 sps:$4 sm:$0xff]   ;;  %v1099_v7 = vld [vmem:[#allocation5 + $0x94] ss:$8 sps:$4 sm:$0xff]  }
  0x41   :  { %284 = vmatprep.subr.bf16.mxu0 %v1031_v26  ;;  %325 = vmatprep.subr.bf16.mxu1 %v1033_v27  ;;  %v1102_v8 = vld [vmem:[#allocation5 + $0x194] ss:$8 sps:$4 sm:$0xff]   ;;  %v1097_v9 = vld [vmem:[#allocation5 + $0x90] ss:$8 sps:$4 sm:$0xff]   ;;  %v1105_v11 = vld [vmem:[#allocation5 + $0xa4] ss:$8 sps:$4 sm:$0xff]  }
  0x42   :  { %v1100_v10 = vld [vmem:[#allocation5 + $0x190] ss:$8 sps:$4 sm:$0xff]   ;;  %v1108_v12 = vld [vmem:[#allocation5 + $0x1a4] ss:$8 sps:$4 sm:$0xff]   ;;  %v1103_v13 = vld [vmem:[#allocation5 + $0xa0] ss:$8 sps:$4 sm:$0xff]  }
  0x43   :  { %v1106_v14 = vld [vmem:[#allocation5 + $0x1a0] ss:$8 sps:$4 sm:$0xff]   ;;  %v1111_v15 = vld [vmem:[#allocation5 + $0xb4] ss:$8 sps:$4 sm:$0xff]   ;;  %v1109_v17 = vld [vmem:[#allocation5 + $0xb0] ss:$8 sps:$4 sm:$0xff]  }
  0x44   :  { %285 = vmatpush1.bf16.msra.mxu0 %v1035_v28  ;;  %326 = vmatpush1.bf16.msra.mxu1 %v1036_v29  ;;  %v1114_v16 = vld [vmem:[#allocation5 + $0x1b4] ss:$8 sps:$4 sm:$0xff]   ;;  %v1112_v18 = vld [vmem:[#allocation5 + $0x1b0] ss:$8 sps:$4 sm:$0xff]   ;;  %v1117_v19 = vld [vmem:[#allocation5 + $0xc4] ss:$8 sps:$4 sm:$0xff]  }
  0x45   :  { %286 = vmatprep.subr.bf16.mxu0 %v1037_v30  ;;  %327 = vmatprep.subr.bf16.mxu1 %v1039_v31  ;;  %v1120_v20 = vld [vmem:[#allocation5 + $0x1c4] ss:$8 sps:$4 sm:$0xff]   ;;  %v1115_v21 = vld [vmem:[#allocation5 + $0xc0] ss:$8 sps:$4 sm:$0xff]   ;;  %v1123_v23 = vld [vmem:[#allocation5 + $0xd4] ss:$8 sps:$4 sm:$0xff]  }
  0x46   :  { %v1118_v22 = vld [vmem:[#allocation5 + $0x1c0] ss:$8 sps:$4 sm:$0xff]   ;;  %v1126_v24 = vld [vmem:[#allocation5 + $0x1d4] ss:$8 sps:$4 sm:$0xff]   ;;  %v1121_v25 = vld [vmem:[#allocation5 + $0xd0] ss:$8 sps:$4 sm:$0xff]  }
  0x47   :  { %v1124_v26 = vld [vmem:[#allocation5 + $0x1d0] ss:$8 sps:$4 sm:$0xff]   ;;  %v1129_v27 = vld [vmem:[#allocation5 + $0xe4] ss:$8 sps:$4 sm:$0xff]   ;;  %v1127_v29 = vld [vmem:[#allocation5 + $0xe0] ss:$8 sps:$4 sm:$0xff]  }
  0x48   :  { %287 = vmatpush1.bf16.msra.mxu0 %v1041_v32  ;;  %328 = vmatpush1.bf16.msra.mxu1 %v1042_v33  ;;  %v1132_v28 = vld [vmem:[#allocation5 + $0x1e4] ss:$8 sps:$4 sm:$0xff]   ;;  %v1130_v30 = vld [vmem:[#allocation5 + $0x1e0] ss:$8 sps:$4 sm:$0xff]   ;;  %v1135_v31 = vld [vmem:[#allocation5 + $0xf4] ss:$8 sps:$4 sm:$0xff]  }
  0x49   :  { %758 = vmatprep.subr.bf16.mxu1 %v1045_v34  ;;  %799 = vmatprep.subr.bf16.mxu0 %v1048_v35  ;;  %v1138_v32 = vld [vmem:[#allocation5 + $0x1f4] ss:$8 sps:$4 sm:$0xff]   ;;  %v1133_v33 = vld [vmem:[#allocation5 + $0xf0] ss:$8 sps:$4 sm:$0xff]   ;;  %v92_v35 = vlaneseq  ;;  %vm879_vm1 = vcmask 3072  }
  0x4a   :  { %v1136_v34 = vld [vmem:[#allocation5 + $0x1f0] ss:$8 sps:$4 sm:$0xff]  }
  0x4b   :  { %305 = vmatmul.mubr.bf16.vlgmr.msra.gmra.mrb[0].mxu0 %v57_v36  ;;  %346 = vmatmul.mubr.bf16.vlgmr.msra.gmra.mrb[0].mxu1 %v57_v36  ;;  %v93_v36 = vshrl.u32 %v92_v35, 7 }
  0x4c   :  { %759 = vmatpush1.bf16.msra.mxu1 %v1043_v37  ;;  %800 = vmatpush1.bf16.msra.mxu0 %v1046_v38 }
  0x4d   :  { %760 = vmatprep.subr.bf16.mxu1 %v1051_v39  ;;  %801 = vmatprep.subr.bf16.mxu0 %v1054_v40  ;;  %v94_v37 = vsub.s32 0, %v93_v36  ;;  %v102_v38 = vsub.s32 2, %v93_v36  ;;  %v90_v39 = vld [vmem:[%s1278_s2] sm:$0xf]  ;;  %v98_v40 = vsub.s32 1, %v93_v36 }
  0x50   :  { %761 = vmatpush1.bf16.msra.mxu1 %v1049_v41  ;;  %802 = vmatpush1.bf16.msra.mxu0 %v1052_v42  ;;  %v106_v41 = vsub.s32 3, %v93_v36  ;;  %v95_v42 = vrot.slane %v90_v39, %v94_v37 }
  0x51   :  { %762 = vmatprep.subr.bf16.mxu1 %v1057_v43  ;;  %803 = vmatprep.subr.bf16.mxu0 %v1060_v44  ;;  %v103_v43 = vrot.slane %v90_v39, %v102_v38  ;;  %v99_v44 = vrot.slane %v90_v39, %v98_v40 }
  0x54   :  { %763 = vmatpush1.bf16.msra.mxu1 %v1055_v45  ;;  %804 = vmatpush1.bf16.msra.mxu0 %v1058_v46  ;;  %v107_v45 = vrot.slane %v90_v39, %v106_v41 }
  0x55   :  { %764 = vmatprep.subr.bf16.mxu1 %v1063_v47  ;;  %805 = vmatprep.subr.bf16.mxu0 %v1066_v48 }
  0x58   :  { %765 = vmatpush1.bf16.msra.mxu1 %v1061_v49  ;;  %806 = vmatpush1.bf16.msra.mxu0 %v1064_v50 }
  0x59   :  { %766 = vmatprep.subr.bf16.mxu1 %v1069_v51  ;;  %807 = vmatprep.subr.bf16.mxu0 %v1072_v52 }
  0x5c   :  { %767 = vmatpush1.bf16.msra.mxu1 %v1067_v53  ;;  %808 = vmatpush1.bf16.msra.mxu0 %v1070_v54 }
  0x5d   :  { %768 = vmatprep.subr.bf16.mxu1 %v1075_v55  ;;  %809 = vmatprep.subr.bf16.mxu0 %v1078_v56 }
  0x60   :  { %769 = vmatpush1.bf16.msra.mxu1 %v1073_v57  ;;  %810 = vmatpush1.bf16.msra.mxu0 %v1076_v58 }
  0x61   :  { %770 = vmatprep.subr.bf16.mxu1 %v1081_v59  ;;  %811 = vmatprep.subr.bf16.mxu0 %v1084_v60 }
  0x64   :  { %771 = vmatpush1.bf16.msra.mxu1 %v1079_v61  ;;  %812 = vmatpush1.bf16.msra.mxu0 %v1082_v62 }
  0x65   :  { %772 = vmatprep.subr.bf16.mxu1 %v1087_v63  ;;  %813 = vmatprep.subr.bf16.mxu0 %v1090_v0 }
  0x68   :  { %773 = vmatpush1.bf16.msra.mxu1 %v1085_v1  ;;  %814 = vmatpush1.bf16.msra.mxu0 %v1088_v2  ;;  %v842_v2 = vld [vmem:[%s1281_s5] sm:$0x3] }
  0x69   :  { %774 = vmatprep.subr.bf16.mxu1 %v1093_v3  ;;  %815 = vmatprep.subr.bf16.mxu0 %v1096_v4  ;;  %v426_v3 = vld [vmem:[%s1280_s4] sm:$0x3]  ;;  %v843_v4 = vunpack.c.l.bf16 %v842_v2 }
  0x6c   :  { %775 = vmatpush1.bf16.msra.mxu1 %v1091_v5  ;;  %816 = vmatpush1.bf16.msra.mxu0 %v1094_v6  ;;  %v431_v5 = vrot.slane %v426_v3, %v94_v37  ;;  %v435_v6 = vrot.slane %v426_v3, %v98_v40 }
  0x6d   :  { %776 = vmatprep.subr.bf16.mxu1 %v1099_v7  ;;  %817 = vmatprep.subr.bf16.mxu0 %v1102_v8  ;;  %v848_v7 = vrot.slane %v843_v4, %v94_v37  ;;  %v852_v8 = vrot.slane %v843_v4, %v102_v38 }
  0x70   :  { %777 = vmatpush1.bf16.msra.mxu1 %v1097_v9  ;;  %818 = vmatpush1.bf16.msra.mxu0 %v1100_v10 }
  0x71   :  { %778 = vmatprep.subr.bf16.mxu1 %v1105_v11  ;;  %819 = vmatprep.subr.bf16.mxu0 %v1108_v12 }
  0x74   :  { %779 = vmatpush1.bf16.msra.mxu1 %v1103_v13  ;;  %820 = vmatpush1.bf16.msra.mxu0 %v1106_v14 }
  0x75   :  { %780 = vmatprep.subr.bf16.mxu1 %v1111_v15  ;;  %821 = vmatprep.subr.bf16.mxu0 %v1114_v16 }
  0x78   :  { %781 = vmatpush1.bf16.msra.mxu1 %v1109_v17  ;;  %822 = vmatpush1.bf16.msra.mxu0 %v1112_v18 }
  0x79   :  { %782 = vmatprep.subr.bf16.mxu1 %v1117_v19  ;;  %823 = vmatprep.subr.bf16.mxu0 %v1120_v20  ;;  %v858_v20 = vrot.slane %v848_v7, %v94_v37 }
  0x7c   :  { %783 = vmatpush1.bf16.msra.mxu1 %v1115_v21  ;;  %824 = vmatpush1.bf16.msra.mxu0 %v1118_v22  ;;  %v862_v22 = vrot.slane %v852_v8, %v94_v37 }
  0x7d   :  { %784 = vmatprep.subr.bf16.mxu1 %v1123_v23  ;;  %825 = vmatprep.subr.bf16.mxu0 %v1126_v24 }
  0x80   :  { %785 = vmatpush1.bf16.msra.mxu1 %v1121_v25  ;;  %826 = vmatpush1.bf16.msra.mxu0 %v1124_v26 }
  0x81   :  { %786 = vmatprep.subr.bf16.mxu1 %v1129_v27  ;;  %827 = vmatprep.subr.bf16.mxu0 %v1132_v28 }
  0x84   :  { %787 = vmatpush1.bf16.msra.mxu1 %v1127_v29  ;;  %828 = vmatpush1.bf16.msra.mxu0 %v1130_v30  ;;  %v983_v30 = vld [vmem:[#allocation2] ss:$0 sm:$0xff] }
  0x85   :  { %788 = vmatprep.subr.bf16.mxu1 %v1135_v31  ;;  %829 = vmatprep.subr.bf16.mxu0 %v1138_v32 }
  0x88   :  { %789 = vmatpush1.bf16.msra.mxu1 %v1133_v33  ;;  %830 = vmatpush1.bf16.msra.mxu0 %v1136_v34 }
 0x11e   :  { %v306_v46 = vpop.f32.mrb[0].mxu0  ;;  %v347_v47 = vpop.f32.mrb[0].mxu1 }
 0x11f   :  { %v307_v48 = vadd.f32 %v306_v46, %v95_v42  ;;  %v348_v49 = vadd.f32 %v347_v47, %v103_v43  ;;  %v308_v50 = vpop.f32.mrb[1].mxu0  ;;  %v349_v51 = vpop.f32.mrb[1].mxu1 }
 0x120   :  { %v309_v52 = vadd.f32 %v308_v50, %v99_v44  ;;  %v350_v53 = vadd.f32 %v349_v51, %v107_v45  ;;  %v310_v54 = vpop.f32.mrb[2].mxu0  ;;  %v351_v55 = vpop.f32.mrb[2].mxu1 }
 0x121   :  { %v354_v56 = vmax.f32 %v307_v48, 0.0  ;;  %v356_v57 = vmax.f32 %v348_v49, 0.0  ;;  %v311_v58 = vpop.f32.mrb[3].mxu0  ;;  %v352_v59 = vpop.f32.mrb[3].mxu1 }
 0x122   :  { %v355_v60 = vmax.f32 %v309_v52, 0.0  ;;  %v357_v61 = vmax.f32 %v350_v53, 0.0 }
 0x123   :  { %v360_v62 = vpack.c.bf16 %v356_v57, %v356_v57  ;;  %v358_v1 = vpack.c.bf16 %v354_v56, %v354_v56 }
 0x124   :  { %v359_v63 = vpack.c.bf16 %v355_v60, %v355_v60  ;;  %v361_v0 = vpack.c.bf16 %v357_v61, %v357_v61 }
 0x126   :  { %790 = vmatprep.mubr.bf16.mxu1 %v359_v63  ;;  %831 = vmatprep.mubr.bf16.mxu0 %v361_v0 }
 0x127   :  { %791 = vmatmul.mubr.bf16.vlgmr.msra.gmra.mrb[4].mxu1 %v358_v1  ;;  %832 = vmatmul.mubr.bf16.vlgmr.msra.gmra.mrb[4].mxu0 %v360_v62 }
 0x1fa   :  { %v792_v9 = vpop.f32.mrb[4].mxu1  ;;  %v833_v10 = vpop.f32.mrb[4].mxu0 }
 0x1fb   :  { %v793_v11 = vadd.f32 %v792_v9, %v431_v5  ;;  %v794_v12 = vpop.f32.mrb[5].mxu1  ;;  %v835_v13 = vpop.f32.mrb[5].mxu0 }
 0x1fc   :  { %v795_v14 = vadd.f32 %v794_v12, %v435_v6  ;;  %v796_v15 = vpop.f32.mrb[6].mxu1  ;;  %v837_v16 = vpop.f32.mrb[6].mxu0 }
 0x1fd   :  { %v834_v17 = vadd.f32 %v833_v10, %v793_v11  ;;  %v797_v18 = vpop.f32.mrb[7].mxu1  ;;  %v838_v19 = vpop.f32.mrb[7].mxu0 }
 0x1fe   :  { %v836_v21 = vadd.f32 %v835_v13, %v795_v14 }
 0x1ff   :  { %v840_v23 = vmax.f32 %v834_v17, 0.0 }
 0x200   :  { %v841_v24 = vmax.f32 %v836_v21, 0.0 }
 0x201   :  { %v863_v25 = vmul.f32 %v858_v20, %v840_v23 }
 0x202   :  { %v864_v26 = vmul.f32 %v862_v22, %v841_v24 }
 0x203   :  { %v866_v27 = vsel %vm865_vm0, %v863_v25, 0.0 }
 0x204   :  { %v867_v28 = vsel %vm865_vm0, %v864_v26, 0.0 }
 0x205   :  { %v868_v29 = vadd.f32 %v867_v28, %v866_v27 }
 0x207   :  { %869 = vadd.xlane.f32.xlu0 %v868_v29 }
 0x294   :  { %v870_v31 = vpop.xlane.xlu0 %869 }
 0x295   :  { %v878_v32 = vadd.f32 %v983_v30, %v870_v31 }
 0x297   :  { %880 = vst.msk [vmem:[%s1283_s7] sm:$0xf] %vm879_vm1, %v878_v32 }
 0x298   :  { %885 = vsyncpa [#allocation4], 1 }
 0x299   :  { %886 = vsyncpa [#allocation6], 1 }

</bundles_post_ra>
